<compile_context>
chip_gen: v7x
topology: tpu7x:2x2x1
jax: 0.10.0
libtpu: 0.0.40
codegen_flags: <defaults>
</compile_context>

<pallas_src>
import jax
import jax.numpy as jnp
from jax import lax
from jax.experimental import pallas as pl
from jax.experimental.pallas import tpu as pltpu


def _round_up(x, m):
    return (x + m - 1) // m * m


# -----------------------------------------------------------------------------
# One-time parameter preparation (hoist out of the per-call forward).
# -----------------------------------------------------------------------------
def make_fused_params(w_pose, b_pose, w_feats, b_feats, njoints, nfeats):
    """Fold poseFinal + featsFinal into a single (D, NJ*OC) weight/bias and
    zero-pad the output-column dim up to a multiple of 128 (lane-dense stores).

    w_pose  : [input_feats, latent_dim]   (PyTorch nn.Linear weight layout)
    b_pose  : [input_feats]
    w_feats : [out_channels, nfeats]
    b_feats : [out_channels]
    """
    input_feats, d = w_pose.shape
    out_channels = w_feats.shape[0]
    assert input_feats == njoints * nfeats

    wp = w_pose.reshape(njoints, nfeats, d)
    # (D, NJ, OC) -> (D, NJ*OC). Weights-only, done once: use highest precision.
    w_fused = jnp.einsum('jfd,cf->djc', wp, w_feats,
                         precision=lax.Precision.HIGHEST)
    w_fused = w_fused.reshape(d, njoints * out_channels)
    b_fused = (jnp.einsum('jf,cf->jc', b_pose.reshape(njoints, nfeats), w_feats,
                          precision=lax.Precision.HIGHEST)
               + b_feats[None, :]).reshape(1, njoints * out_channels)

    out_cols = njoints * out_channels
    n_pad = _round_up(out_cols, 128)
    if n_pad != out_cols:
        w_fused = jnp.pad(w_fused, ((0, 0), (0, n_pad - out_cols)))
        b_fused = jnp.pad(b_fused, ((0, 0), (0, n_pad - out_cols)))
    return w_fused, b_fused, out_cols


# -----------------------------------------------------------------------------
# Kernel: one grid step = one tile of rows of the flattened [bs*nframes, D]
# input; single MXU matmul with f32 accumulation + bias, lane-dense output.
# -----------------------------------------------------------------------------
def _output_process_kernel(x_ref, w_ref, b_ref, out_ref):
    # x_ref: (TM, D), w_ref: (D, N_pad), b_ref: (1, N_pad), out_ref: (TM, N_pad)
    acc = lax.dot_general(
        x_ref[...], w_ref[...],
        dimension_numbers=(((1,), (0,)), ((), ())),
        preferred_element_type=jnp.float32)
    out_ref[...] = (acc + b_ref[...].astype(jnp.float32)).astype(out_ref.dtype)


def output_process_forward(x, w_fused, b_fused, njoints, out_cols, *, tm=None):
    """Pallas implementation of OutputProcess.forward using fused params.

    x       : [bs, nframes, latent_dim]
    w_fused : [latent_dim, N_pad]   (from make_fused_params)
    b_fused : [1, N_pad]
    returns : [bs, out_channels, nframes, njoints]
    """
    bs, nframes, d = x.shape
    n_pad = w_fused.shape[1]
    out_channels = out_cols // njoints
    M = bs * nframes
    xm = x.reshape(M, d)

    # Row tile: as large as reasonable (mem-bound roofline flattens ~1024),
    # multiple of 8 sublanes, and >= 2 tiles so v7x's two TCs both get work.
    if tm is None:
        tm = min(1024, _round_up(M, 8))
        tm = min(tm, max(8, _round_up(pl.cdiv(M, 2), 8)))
    Mp = _round_up(M, tm)
    if Mp != M:
        xm = jnp.pad(xm, ((0, Mp - M), (0, 0)))

    # Explicit scoped-VMEM budget: double-buffered x/out tiles + resident weights.
    x_bytes = jnp.dtype(x.dtype).itemsize
    w_bytes = jnp.dtype(w_fused.dtype).itemsize
    need = 2 * (tm * d + tm * n_pad) * x_bytes + (d * n_pad + n_pad) * w_bytes
    vmem_limit = int(min(100 * 1024 * 1024, max(2 * need, 8 * 1024 * 1024)))

    out_flat = pl.pallas_call(
        _output_process_kernel,
        out_shape=jax.ShapeDtypeStruct((Mp, n_pad), x.dtype),
        grid_spec=pltpu.PrefetchScalarGridSpec(
            num_scalar_prefetch=0,
            grid=(Mp // tm,),
            in_specs=[
                pl.BlockSpec((tm, d), lambda i: (i, 0)),      # x row tile (streamed)
                pl.BlockSpec((d, n_pad), lambda i: (0, 0)),   # fused weight (resident)
                pl.BlockSpec((1, n_pad), lambda i: (0, 0)),   # fused bias (resident)
            ],
            out_specs=pl.BlockSpec((tm, n_pad), lambda i: (i, 0)),
        ),
        compiler_params=pltpu.CompilerParams(
            dimension_semantics=("parallel",),
            vmem_limit_bytes=vmem_limit),
    )(xm, w_fused, b_fused)

    # Drop row padding and zero-padded columns; reshape to [bs, T, NJ, OC].
    out = out_flat[:M, :out_cols].reshape(bs, nframes, njoints, out_channels)
    # permute(0, 3, 1, 2): layout plumbing outside the kernel.
    return jnp.transpose(out, (0, 3, 1, 2))


def _reference(x, w_pose, b_pose, w_feats, b_feats, njoints, nfeats):
    """Pure-JAX reference matching the PyTorch forward exactly."""
    bs, nframes, d = x.shape
    y = jnp.einsum('btd,pd->btp', x, w_pose) + b_pose            # poseFinal
    y = y.reshape(bs, nframes, njoints, nfeats)
    z = jnp.einsum('btjf,cf->btjc', y, w_feats) + b_feats        # featsFinal
    return jnp.transpose(z, (0, 3, 1, 2))                        # permute(0,3,1,2)


if __name__ == "__main__":
    # Small, deterministic shapes consistent with the module.
    bs, nframes = 2, 8
    latent_dim, njoints, nfeats, out_channels = 32, 16, 4, 6
    input_feats = njoints * nfeats

    key = jax.random.PRNGKey(0)
    k1, k2, k3, k4, k5 = jax.random.split(key, 5)
    x = jax.random.normal(k1, (bs, nframes, latent_dim), dtype=jnp.float32)
    w_pose = jax.random.normal(k2, (input_feats, latent_dim), dtype=jnp.float32) * 0.1
    b_pose = jax.random.normal(k3, (input_feats,), dtype=jnp.float32) * 0.1
    w_feats = jax.random.normal(k4, (out_channels, nfeats), dtype=jnp.float32) * 0.1
    b_feats = jax.random.normal(k5, (out_channels,), dtype=jnp.float32) * 0.1

    # One-time parameter preparation (kept out of the per-call forward).
    w_fused, b_fused, out_cols = make_fused_params(
        w_pose, b_pose, w_feats, b_feats, njoints, nfeats)

    out = output_process_forward(x, w_fused, b_fused, njoints, out_cols)
    out = jax.block_until_ready(out)

    ref = _reference(x, w_pose, b_pose, w_feats, b_feats, njoints, nfeats)
    assert out.shape == (bs, out_channels, nframes, njoints), out.shape
    # Fused weights re-associate the f32 math; allow last-ulps differences.
    assert jnp.allclose(out, ref, atol=1e-4, rtol=1e-4), "mismatch vs reference"

    print("KERNEL_OK")
</pallas_src>

<mosaic_0001>
module attributes {stable_mosaic.version = 11 : i64} {
  func.func @_output_process_kernel(%arg0: i32, %arg1: memref<8x32xf32, #tpu.memory_space<vmem>>, %arg2: memref<32x128xf32, #tpu.memory_space<vmem>>, %arg3: memref<1x128xf32, #tpu.memory_space<vmem>>, %arg4: memref<8x128xf32, #tpu.memory_space<vmem>>) attributes {dimension_semantics = [#tpu.dimension_semantics<parallel>], iteration_bounds = array<i64: 2>, scalar_prefetch = 0 : i64, scratch_operands = 0 : i64, tpu.core_type = #tpu.core_type<tc>, window_params = [{transform_indices = @transform_0, window_bounds = array<i64: 8, 32>}, {pipeline_mode = #tpu.pipeline_mode<synchronous>, transform_indices = @transform_1, window_bounds = array<i64: 32, 128>}, {pipeline_mode = #tpu.pipeline_mode<synchronous>, transform_indices = @transform_2, window_bounds = array<i64: 1, 128>}, {transform_indices = @transform_3, window_bounds = array<i64: 8, 128>}]} {
    %c0 = arith.constant 0 : index
    %c0_0 = arith.constant 0 : index
    %0 = vector.load %arg1[%c0, %c0_0] : memref<8x32xf32, #tpu.memory_space<vmem>>, vector<8x32xf32>
    %c0_1 = arith.constant 0 : index
    %c0_2 = arith.constant 0 : index
    %1 = vector.load %arg2[%c0_1, %c0_2] : memref<32x128xf32, #tpu.memory_space<vmem>>, vector<32x128xf32>
    %cst = arith.constant dense<0.000000e+00> : vector<8x128xf32>
    %2 = tpu.matmul %0, %1, %cst {dimension_numbers = #tpu.dot_dimension_numbers<[1], [0], [0], [1], [0, 0, 1, 1], [], []>} : vector<8x32xf32>, vector<32x128xf32>, vector<8x128xf32> -> vector<8x128xf32>
    %c0_3 = arith.constant 0 : index
    %c0_4 = arith.constant 0 : index
    %3 = vector.load %arg3[%c0_3, %c0_4] : memref<1x128xf32, #tpu.memory_space<vmem>>, vector<1x128xf32>
    %4 = vector.broadcast %3 : vector<1x128xf32> to vector<8x128xf32>
    %5 = arith.addf %2, %4 : vector<8x128xf32>
    %c0_5 = arith.constant 0 : index
    %c0_6 = arith.constant 0 : index
    %6 = vector.load %arg4[%c0_5, %c0_6] : memref<8x128xf32, #tpu.memory_space<vmem>>, vector<8x128xf32>
    tpu.vector_store %arg4[%c0_5, %c0_6], %5 {strides = array<i32>} : memref<8x128xf32, #tpu.memory_space<vmem>>, vector<8x128xf32>,
    return
  }
  func.func @transform_0(%arg0: i32) -> (i32, i32) {
    %c0_i32 = arith.constant 0 : i32
    %c0_i32_0 = arith.constant 0 : i32
    return %arg0, %c0_i32 : i32, i32
  }
  func.func @transform_1(%arg0: i32) -> (i32, i32) {
    %c0_i32 = arith.constant 0 : i32
    %c0_i32_0 = arith.constant 0 : i32
    %c0_i32_1 = arith.constant 0 : i32
    return %c0_i32, %c0_i32_0 : i32, i32
  }
  func.func @transform_2(%arg0: i32) -> (i32, i32) {
    %c0_i32 = arith.constant 0 : i32
    %c0_i32_0 = arith.constant 0 : i32
    %c0_i32_1 = arith.constant 0 : i32
    return %c0_i32, %c0_i32_0 : i32, i32
  }
  func.func @transform_3(%arg0: i32) -> (i32, i32) {
    %c0_i32 = arith.constant 0 : i32
    %c0_i32_0 = arith.constant 0 : i32
    return %arg0, %c0_i32 : i32, i32
  }
}

</mosaic_0001>

<bundles_post_ra>
// kernel: tpu_custom_call.1
= control target key start
LH: loop header
LB: loop body
LE: loop exit
PB: predicated region body
PF: predicated region fallthrough
CT: control target
= control target key end

     0   :  { %8 = vsyncpa [#allocation3], 0  ;;  %s839_s0 = inlined_call_operand.hbm [shape: f32[16,32], index: 0, kind: input, shape index: {}]   ;;  %s840_s1 = inlined_call_operand.hbm [shape: f32[32,128], index: 1, kind: input, shape index: {}]   ;;  %s841_s2 = inlined_call_operand.vmem [shape: f32[1,128], index: 2, kind: input, shape index: {}]   ;;  %s842_s3 = inlined_call_operand.hbm [shape: f32[16,128], index: 3, kind: output, shape index: {}]  }
   0x1   :  { %10 = vsyncpa [#allocation3 + $0x1], 0 }
   0x2   :  { %11 = vsyncpa [#allocation6], 0 }
   0x3   :  { %12 = vsyncpa [#allocation4], 0 }
   0x4   :  { %14 = vsyncpa [#allocation4 + $0x1], 0  ;;  %s640_s12 = smov 0   ;;  %s642_s13 = smov 0  }
   0x5   :  { %s644_s14 = smov 0   ;;  %s646_s15 = smov 0  }
   0x6 LB: > { %s661_s16 = sadd.s32 4294967295, %s610_s15   ;;  %s382_s17 = sadd.s32 4294967294, %s610_s15   ;;  %s610_s15 = sphi %s646_s15, %s862_s15   ;;  %s606_s14 = sphi %s644_s14, %s861_s14   ;;  %s602_s13 = sphi %s642_s13, %s860_s13   ;;  %s598_s12 = sphi %s640_s12, %s859_s12  }
   0x7   : > { %p40_p0 = scmp.ne.s32.totalorder %s602_s13, %s598_s12  ;;  %p843_p1 = scmp.eq.s32.totalorder %s661_s16, 0 }
   0x8   : > { %p112_p3 = scmp.eq.s32.totalorder %s382_s17, 1  ;;  %p383_p5 = scmp.ge.s32.totalorder %s610_s15, 1 }
   0x9   : > { %p670_p4 = por %p843_p1, %p40_p0  ;;  %p119_p7 = scmp.lt.s32.totalorder %s610_s15, 3 }
   0xa   : > { %p675_p6 = por %p112_p3, %p40_p0  ;;  %s612_s21 = smov [#allocation5]  }
   0xb   : > { %s846_s18 = scalar_select %p670_p4, 1, 0 }
   0xc   : > { %s847_s19 = scalar_select %p675_p6, 1, 0 }
   0xd   : > { %p680_p8 = pnand %p383_p5, %p119_p7  ;;  %s131_s22 = sshll.u32 %s612_s21, 4  ;;  %s684_s22 = int_to_ptr.vmem [resolvable:$true] %s131_s22 }
   0xe   : > { %s696_s24 = sadd.s32 1, %s610_s15   ;;  %s27_s25 = sadd.s32 1, %s606_s14 }
   0xf   : > { %s848_s20 = scalar_select %p680_p8, 1, 0 }
  0x10   : > { %p428_p9 = pneg %p680_p8  ;;  %s24_s26 = ssub.s32 %s610_s15, %s696_s24 }
  0x11   : > { %s482_s29 = scalar_lea.hbm %s840_s1, 512 }
  0x12   : > { %p691_p11 = pnand %p428_p9, %p843_p1  ;;  %p483_p12 = scmp.ne.s32.totalorder %s840_s1, %s482_s29 }
  0x13   : > { %p489_p5 = scmp.lt.u32.totalorder %s482_s29, %s840_s1 }
  0x14   : > { %p484_p13 = pneg %p691_p11 }
  0x16   : > { %p485_p0 = pnand %p484_p13, %p483_p12 }
  0x18   : > { %p486_p3 = pneg %p485_p0 }
  0x1a   : > { %p491_p7 = pnand %p489_p5, %p486_p3 }
  0x1c   : > { %494 = shalt.err (!%p491_p7)
}
  0x1d   : > { %s495_s7 = scalar_lea.vmem %s684_s22, 512  ;;  %p503_p2 = scmp.lt.s32.totalorder %s684_s22, %s684_s22 }
  0x1e   : > { %p496_p9 = scmp.ne.s32.totalorder %s684_s22, %s495_s7  ;;  %p504_p6 = scmp.lt.s32.totalorder %s495_s7, %s495_s7 }
  0x20   : > { %p498_p10 = pnand %p496_p9, %p484_p13  ;;  %p505_p4 = por %p504_p6, %p503_p2 }
  0x22   : > { %p499_p1 = pneg %p498_p10 }
  0x24   : > { %p506_p8 = pnand %p505_p4, %p499_p1 }
  0x26   : > { %509 = shalt.err (!%p506_p8)
}
  0x27   : > { %s613_s8 = smov 128   ;;  %s614_s9 = smov 8  }
  0x28   : > { %431 = dma.hbm_to_vmem [thread:$0]  (!%p691_p11), %s840_s1, 512, %s684_s22, [#allocation6], %s613_s8, %s613_s8, %s614_s9  }
  0x29   : > { %p25_p2 = scmp.eq.s32.totalorder %s24_s26, 0  ;;  %p34_p1 = scmp.ne.s32.totalorder %s606_s14, %s602_s13 }
  0x2a   : > { %p35_p4 = scmp.eq.s32.totalorder %s610_s15, 0  ;;  %p441_p6 = scmp.lt.s32.totalorder %s610_s15, 2 }
  0x2b   : > { %s727_s17 = scalar_select %p25_p2, %s606_s14, %s27_s25  }
  0x2c   : > { %p36_p8 = por %p35_p4, %p34_p1  ;;  %p850_p10 = scmp.eq.s32.totalorder %s661_s16, 1 }
  0x2d   : > { %s148_s27 = sand.u32 1, %s606_s14   ;;  %s387_s28 = sshll.u32 %s610_s15, 7 }
  0x2e   : > { %p731_p12 = por %p850_p10, %p34_p1  ;;  %s386_s29 = sshll.u32 %s148_s27, 3 }
  0x2f   : > { %s740_s4 = scalar_lea.hbm %s839_s0, %s387_s28  ;;  %s152_s22 = scalar_lea.vmem [#allocation2], %s386_s29 }
  0x30   : > { %s159_s25 = sshll.u32 %s152_s22, 4  ;;  %p742_p11 = pnand %p441_p6, %p36_p8  ;;  %s746_s25 = int_to_ptr.vmem [resolvable:$true] %s159_s25 }
  0x31   : > { %s149_s5 = scalar_lea.sflag [#allocation3], %s148_s27  ;;  %s510_s6 = scalar_lea.hbm %s740_s4, 128 }
  0x32   : > { %p511_p13 = scmp.ne.s32.totalorder %s740_s4, %s510_s6  ;;  %p512_p0 = pneg %p742_p11 }
  0x33   : > { %s515_s9 = scalar_lea.hbm %s839_s0, 256  ;;  %p516_p7 = scmp.lt.u32.totalorder %s740_s4, %s839_s0 }
  0x34   : > { %p513_p3 = pnand %p512_p0, %p511_p13  ;;  %p517_p9 = scmp.lt.u32.totalorder %s515_s9, %s510_s6 }
  0x35   : > { %p519_p1 = scmp.lt.u32.totalorder %s510_s6, %s740_s4 }
  0x36   : > { %p514_p5 = pneg %p513_p3  ;;  %p518_p2 = por %p517_p9, %p516_p7 }
  0x38   : > { %p520_p4 = por %p519_p1, %p518_p2 }
  0x3a   : > { %p521_p6 = pnand %p520_p4, %p514_p5 }
  0x3c   : > { %524 = shalt.err (!%p521_p6)
}
  0x3d   : > { %s525_s27 = scalar_lea.vmem %s746_s25, 128  ;;  %s615_s28 = smov [#allocation2]  }
  0x3e   : > { %p526_p8 = scmp.ne.s32.totalorder %s746_s25, %s525_s27  ;;  %s530_s29 = sshll.u32 %s615_s28, 4  ;;  %s531_s29 = int_to_ptr.vmem [resolvable:$false] %s530_s29 }
  0x3f   : > { %s532_s23 = scalar_lea.vmem %s531_s29, 256  ;;  %p533_p3 = scmp.lt.s32.totalorder %s746_s25, %s531_s29 }
  0x40   : > { %p528_p10 = pnand %p526_p8, %p512_p0  ;;  %p534_p7 = scmp.lt.s32.totalorder %s532_s23, %s525_s27 }
  0x42   : > { %p529_p13 = pneg %p528_p10  ;;  %p535_p9 = por %p534_p7, %p533_p3 }
  0x44   : > { %p536_p2 = pnand %p535_p9, %p529_p13 }
  0x46   : > { %539 = shalt.err (!%p536_p2)
}
  0x47   : > { %435 = dma.hbm_to_vmem [thread:$0]  (!%p742_p11), %s740_s4, 128, %s746_s25, %s149_s5  }
  0x48   : > { %p853_p5 = scmp.ne.s32.totalorder %s848_s20, 0 }
  0x49   : > { %s776_s30 = sand.u32 (!%p853_p5), 1, %s602_s13   ;;  %p854_p0 = scmp.ne.s32.totalorder (!%p853_p5), %s846_s18, 0 }
  0x4a   : > { %168 = sbr.rel (%p853_p5) target bundleno = 323 (0x143), region = 32  ;;  %s389_s22 = sshll.u32 (!%p853_p5), %s776_s30, 3 }
  0x4b   : > { %s171_s6 = scalar_lea.sflag (!%p853_p5), [#allocation3], %s776_s30  ;;  %s174_s7 = scalar_lea.vmem (!%p853_p5), [#allocation2], %s389_s22 }
  0x51   : > { %585 = dma.done.wait (%p854_p0), %s171_s6, 128  }
  0x52   : > { %587 = vsyncadd (%p854_p0), %s171_s6, 4294967168  ;;  %p855_p1 = scmp.eq.s32.totalorder %s661_s16, 0 }
  0x54   : > { %589 = dma.done.wait (%p855_p1), [#allocation6], 512   ;;  %p856_p11 = pmov %p855_p1 }
  0x55   : > { %v616_v0 = vmov 0.0|0.0   ;;  %vm617_vm0 = vmmov 0   ;;  %v618_v1 = vmov 0.0   ;;  %v202_v2 = vld [vmem:[#allocation5] sm:$0xff]  ;;  %v203_v3 = vld [vmem:[#allocation5 + $0x8] sm:$0xff]  ;;  %v204_v4 = vld [vmem:[#allocation5 + $0x10] sm:$0xff] }
  0x56   : > { %591 = vsyncadd (%p856_p11), [#allocation6], 4294966784  ;;  %414 = vmatprep.subr.bf16.mxu0 %v616_v0  ;;  %411 = vmatprep.mubr.msk.f32.mxu0 %vm617_vm0, %v618_v1  ;;  %v415_v5 = vpack.c.bf16 %v203_v3, %v202_v2  ;;  %v205_v6 = vld [vmem:[#allocation5 + $0x18] sm:$0xff]  ;;  %vm213_vm1 = vcmask 261120   ;;  %v392_v9 = vld [vmem:[%s841_s2] ss:$0 sm:$0xff] }
  0x57   : > { %v418_v7 = vpack.c.bf16 %v205_v6, %v204_v4  ;;  %v201_v8 = vld [vmem:[%s174_s7] sm:$0xff]  ;;  %s395_s4 = sshll.u32 %s661_s16, 7  ;;  %s200_s25 = scalar_lea.vmem [#allocation7], %s389_s22 }
  0x58   : > { %416 = vmatpush3.bf16.msra.mxu0 %v415_v5  ;;  %s302_s26 = sshll.u32 %s200_s25, 4  ;;  %s795_s9 = scalar_lea.hbm %s842_s3, %s395_s4  ;;  %s797_s26 = int_to_ptr.vmem [resolvable:$true] %s302_s26 }
  0x59   : > { %417 = vmatprep.subr.bf16.mxu0 %v616_v0  ;;  %s289_s10 = scalar_lea.sflag [#allocation4], %s776_s30  ;;  %s540_s11 = scalar_lea.vmem %s797_s26, 128 }
  0x5a   : > { %p541_p4 = scmp.ne.s32.totalorder %s797_s26, %s540_s11  ;;  %s619_s16 = smov [#allocation7]  }
  0x5b   : > { %s544_s27 = sshll.u32 %s619_s16, 4  ;;  %s545_s27 = int_to_ptr.vmem [resolvable:$false] %s544_s27 }
  0x5c   : > { %419 = vmatpush3.bf16.msra.mxu0 %v418_v7  ;;  %p542_p6 = pnand %p541_p4, %p731_p12  ;;  %s546_s28 = scalar_lea.vmem %s545_s27, 256 }
  0x5d   : > { %p547_p10 = scmp.lt.s32.totalorder %s797_s26, %s545_s27  ;;  %p548_p13 = scmp.lt.s32.totalorder %s546_s28, %s540_s11 }
  0x5e   : > { %p543_p8 = pneg %p542_p6 }
  0x5f   : > { %412 = vmatmul.mubr.msk.f32.vlgmr.msra.gmra.mrb[0].mxu0 %vm213_vm1, %v201_v8  ;;  %p549_p3 = por %p548_p13, %p547_p10 }
  0x61   : > { %p550_p7 = pnand %p549_p3, %p543_p8 }
 0x132   : > { %v283_v10 = vpop.f32.mrb[0].mxu0 }
 0x133   : > { %v284_v11 = vadd.f32 %v392_v9, %v283_v10  ;;  %v413_v12 = vpop.f32.mrb[1].mxu0 }
 0x135   : > { %287 = vst [vmem:[%s200_s25] sm:$0xff] %v284_v11 }
 0x136   : > { %553 = shalt.err (!%p550_p7)
}
 0x137   : > { %s554_s29 = scalar_lea.hbm %s795_s9, 128  ;;  %s558_s22 = scalar_lea.hbm %s842_s3, 256 }
 0x138   : > { %p555_p9 = scmp.ne.s32.totalorder %s795_s9, %s554_s29  ;;  %p559_p0 = scmp.lt.u32.totalorder %s795_s9, %s842_s3 }
 0x139   : > { %p560_p1 = scmp.lt.u32.totalorder %s558_s22, %s554_s29  ;;  %p562_p4 = scmp.lt.u32.totalorder %s554_s29, %s795_s9 }
 0x13a   : > { %p556_p2 = pnand %p555_p9, %p731_p12 }
 0x13b   : > { %p561_p11 = por %p560_p1, %p559_p0 }
 0x13c   : > { %p557_p5 = pneg %p556_p2 }
 0x13d   : > { %p563_p6 = por %p562_p4, %p561_p11 }
 0x13f   : > { %p564_p8 = pnand %p563_p6, %p557_p5 }
 0x141   : > { %567 = shalt.err (!%p564_p8)
}
 0x142   : > { %426 = dma.vmem_to_hbm [thread:$0]  (%p731_p12), %s797_s26, 128, %s795_s9, %s289_s10  }
 0x143 PF: > { %s314_s18 = sand.u32 1, %s598_s12   ;;  %p857_p10 = scmp.ne.s32.totalorder %s847_s19, 0 }
 0x144   : > { %p858_p13 = scmp.ge.s32.totalorder %s610_s15, 2  ;;  %s315_s20 = scalar_lea.sflag [#allocation4], %s314_s18 }
 0x146   : > { %p437_p3 = pnand %p858_p13, %p857_p10 }
 0x148   : > { %593 = dma.done.wait (!%p437_p3), %s315_s20, 128  }
 0x149   : > { %595 = vsyncadd (!%p437_p3), %s315_s20, 4294967168  ;;  %p17_p7 = scmp.ge.s32.totalorder %s696_s24, 4   ;;  %s859_s12 = smov %s602_s13 }
 0x14a   : > { %s860_s13 = smov %s606_s14  ;;  %s861_s14 = smov %s727_s17 }
 0x14b   : > { %s862_s15 = smov %s696_s24  ;;  %19 = sbr.rel (!%p17_p7) target bundleno = 6 (0x6), region = 81 }
 0x152   :  { %320 = vsyncpa [#allocation3], 1 }
 0x153   :  { %322 = vsyncpa [#allocation3 + $0x1], 1 }
 0x154   :  { %323 = vsyncpa [#allocation6], 1 }
 0x155   :  { %324 = vsyncpa [#allocation4], 1 }
 0x156   :  { %326 = vsyncpa [#allocation4 + $0x1], 1 }

</bundles_post_ra>
